<compile_context>
chip_gen: v5e
topology: v5e:2x2
jax: 0.10.0
libtpu: 0.0.40
codegen_flags: <defaults>
</compile_context>

<pallas_src>
import functools

import jax
import jax.numpy as jnp
from jax import lax
from jax.experimental import pallas as pl
from jax.experimental.pallas import tpu as pltpu


def decode_structure_kernel(x_ref, w1_ref, b1_ref, w2_ref, b2_ref,
                            wh_ref, bh_ref, head_ref, *, n_out):
    # Matmul compute dtype follows the (pre-cast) weights; x is cast in-kernel
    # so the wrapper never does an extra HBM pass over x.
    cdt = w1_ref.dtype

    # linear_1 + relu  (f32 accumulation, f32 activations)
    h = jnp.dot(x_ref[...].astype(cdt), w1_ref[...],
                preferred_element_type=jnp.float32) + b1_ref[...]
    h = jnp.maximum(h, 0.0)

    # linear_2 + relu
    h = jnp.dot(h.astype(cdt), w2_ref[...],
                preferred_element_type=jnp.float32) + b2_ref[...]
    h = jnp.maximum(h, 0.0)

    # fused heads: one (24 -> 2*n_out) matmul; cols [0, n_out) = exp head,
    # cols [n_out, 2*n_out) = softplus head.
    z = jnp.dot(h.astype(cdt), wh_ref[...],
                preferred_element_type=jnp.float32) + bh_ref[...]

    # Shared exp between the two heads (one exp + one log1p per vreg instead
    # of three transcendentals).  z > 20 guard keeps softplus exact/safe; for
    # huge z the exp head legitimately returns +inf (matches torch.exp).
    ez = jnp.exp(z)
    sp = jnp.where(z > 20.0, z, jnp.log1p(ez)) + 1e-8

    # (1, dh) column mask, broadcast by jnp.where (no per-row iota vregs).
    col = lax.broadcasted_iota(jnp.int32, (1, z.shape[-1]), 1)
    head_ref[...] = jnp.where(col < n_out, ez, sp)


def prepare_params(params, matmul_dtype=jnp.bfloat16):
    """One-time weight prep: transpose to (in, out), fuse the two heads into a
    single (24, 6) matrix, cast matmul weights (bf16 by default, f32 accum in
    the kernel).  Call once and reuse across forward calls."""
    w1 = params["w1"].T.astype(matmul_dtype)
    w2 = params["w2"].T.astype(matmul_dtype)
    wh = jnp.concatenate([params["wo"].T, params["ws"].T],
                         axis=1).astype(matmul_dtype)            # (24, 6)
    b1 = params["b1"][None, :].astype(jnp.float32)
    b2 = params["b2"][None, :].astype(jnp.float32)
    bh = jnp.concatenate([params["bo"], params["bs"]])[None, :].astype(jnp.float32)
    return dict(w1=w1, b1=b1, w2=w2, b2=b2, wh=wh, bh=bh,
                n_out=int(params["wo"].shape[0]))


def decode_structure_forward(x, params, *, tile_b=4096):
    """x: [B, hidden_dim] float32 (left in its own dtype in HBM).
    params: output of prepare_params() (raw PyTorch-style params also accepted).
    Returns (out, v), each [B, 3] float32."""
    if "wh" not in params:                       # convenience: raw params
        params = prepare_params(params)
    w1, b1 = params["w1"], params["b1"]
    w2, b2 = params["w2"], params["b2"]
    wh, bh = params["wh"], params["bh"]
    n_out = params["n_out"]

    B, H = x.shape
    d1 = w1.shape[1]                             # 72
    d2 = w2.shape[1]                             # 24
    dh = wh.shape[1]                             # 6

    sublane = 8                                  # x stays f32 in HBM
    itemsize_x = jnp.dtype(x.dtype).itemsize

    def _round_up(v, m):
        return ((v + m - 1) // m) * m

    # VMEM-aware tile sizing: double-buffered x tile + out tile must fit a
    # conservative budget that holds on every gen (v5e 16 MiB scoped default,
    # v6e 32 MiB, v7x 64 MiB physical) without touching vmem_limit_bytes.
    vmem_budget = 12 << 20
    bytes_per_row = 2 * (H * itemsize_x + dh * 4)
    tile_cap = max(sublane, min(int(tile_b), vmem_budget // bytes_per_row))

    # >= 2 grid steps whenever B allows it so v7x's two TensorCores both get
    # work (grid axis is marked "parallel").  No padding: ragged tails use
    # Pallas partial final blocks (junk OOB reads, dropped OOB writes).
    n_target = max(2, pl.cdiv(B, tile_cap)) if B >= 2 * sublane else 1
    eff_tile = max(sublane, _round_up(pl.cdiv(B, n_target), sublane))
    n_tiles = pl.cdiv(B, eff_tile)

    w_itemsize = jnp.dtype(w1.dtype).itemsize
    flops = 2 * B * (H * d1 + d1 * d2 + d2 * dh)
    transcendentals = 2 * B * dh                 # shared exp + log1p
    bytes_accessed = (B * H * itemsize_x                          # x read
                      + (H * d1 + d1 * d2 + d2 * dh) * w_itemsize # weights
                      + (d1 + d2 + dh) * 4                        # biases
                      + B * dh * 4)                               # head write
    cost = pl.CostEstimate(flops=int(flops),
                           transcendentals=int(transcendentals),
                           bytes_accessed=int(bytes_accessed))

    # Grid-invariant weight/bias blocks (constant index_map -> DMA'd once).
    const = lambda shp: pl.BlockSpec(shp, lambda i: (0, 0))

    grid_spec = pltpu.PrefetchScalarGridSpec(
        num_scalar_prefetch=0,
        grid=(n_tiles,),
        in_specs=[
            pl.BlockSpec((eff_tile, H), lambda i: (i, 0)),   # x tile
            const((H, d1)), const((1, d1)),                  # linear_1
            const((d1, d2)), const((1, d2)),                 # linear_2
            const((d2, dh)), const((1, dh)),                 # fused heads
        ],
        out_specs=pl.BlockSpec((eff_tile, dh), lambda i: (i, 0)),
    )

    head = pl.pallas_call(
        functools.partial(decode_structure_kernel, n_out=n_out),
        grid_spec=grid_spec,
        out_shape=jax.ShapeDtypeStruct((B, dh), jnp.float32),
        compiler_params=pltpu.CompilerParams(
            dimension_semantics=("parallel",)),
        cost_estimate=cost,
    )(x, w1, b1, w2, b2, wh, bh)

    return head[:, :n_out], head[:, n_out:]


def init_params(key, hidden_dim):
    """Deterministic init matching nn.Linear shapes (uniform +/- 1/sqrt(fan_in))."""
    def linear(key, in_dim, out_dim):
        kw, kb = jax.random.split(key)
        bound = 1.0 / jnp.sqrt(in_dim)
        w = jax.random.uniform(kw, (out_dim, in_dim), jnp.float32, -bound, bound)
        b = jax.random.uniform(kb, (out_dim,), jnp.float32, -bound, bound)
        return w, b

    k1, k2, k3, k4 = jax.random.split(key, 4)
    w1, b1 = linear(k1, hidden_dim, 72)
    w2, b2 = linear(k2, 72, 24)
    wo, bo = linear(k3, 24, 3)
    ws, bs = linear(k4, 24, 3)
    return dict(w1=w1, b1=b1, w2=w2, b2=b2, wo=wo, bo=bo, ws=ws, bs=bs)


def reference_forward(x, params):
    """Pure-JAX reference of the PyTorch forward pass."""
    h = jnp.maximum(x @ params["w1"].T + params["b1"], 0.0)
    h = jnp.maximum(h @ params["w2"].T + params["b2"], 0.0)
    out = jnp.exp(h @ params["wo"].T + params["bo"])
    v = jax.nn.softplus(h @ params["ws"].T + params["bs"]) + 1e-8
    return out, v


if __name__ == "__main__":
    hidden_dim = 32     # net_parameters['hidden_dim']
    batch = 16

    key = jax.random.PRNGKey(0)
    kx, kp = jax.random.split(key)
    x = jax.random.normal(kx, (batch, hidden_dim), jnp.float32)
    params = init_params(kp, hidden_dim)
    out_ref, v_ref = reference_forward(x, params)

    # f32 matmul path: tight tolerance against the pure-JAX reference.
    prep_f32 = prepare_params(params, matmul_dtype=jnp.float32)
    out, v = jax.block_until_ready(decode_structure_forward(x, prep_f32))
    assert out.shape == (batch, 3) and v.shape == (batch, 3)
    assert jnp.allclose(out, out_ref, rtol=1e-5, atol=1e-5)
    assert jnp.allclose(v, v_ref, rtol=1e-5, atol=1e-5)

    # Ragged batch: exercises the partial-final-block path (no jnp.pad copy).
    xr = x[:13]
    out_r, v_r = jax.block_until_ready(decode_structure_forward(xr, prep_f32))
    out_rr, v_rr = reference_forward(xr, params)
    assert out_r.shape == (13, 3) and v_r.shape == (13, 3)
    assert jnp.allclose(out_r, out_rr, rtol=1e-5, atol=1e-5)
    assert jnp.allclose(v_r, v_rr, rtol=1e-5, atol=1e-5)

    # Default path: bf16 matmul weights, in-kernel x cast, f32 accumulation.
    prep_bf16 = prepare_params(params)          # bf16 is the default
    out_bf, v_bf = jax.block_until_ready(decode_structure_forward(x, prep_bf16))
    assert out_bf.shape == (batch, 3) and v_bf.shape == (batch, 3)
    assert jnp.allclose(out_bf, out_ref, rtol=1e-1, atol=1e-1)
    assert jnp.allclose(v_bf, v_ref, rtol=1e-1, atol=1e-1)

    print("KERNEL_OK")
</pallas_src>

<mosaic_0001>
module attributes {stable_mosaic.version = 11 : i64} {
  func.func @decode_structure_kernel(%arg0: i32, %arg1: memref<8x32xf32, #tpu.memory_space<vmem>>, %arg2: memref<32x72xf32, #tpu.memory_space<vmem>>, %arg3: memref<1x72xf32, #tpu.memory_space<vmem>>, %arg4: memref<72x24xf32, #tpu.memory_space<vmem>>, %arg5: memref<1x24xf32, #tpu.memory_space<vmem>>, %arg6: memref<24x6xf32, #tpu.memory_space<vmem>>, %arg7: memref<1x6xf32, #tpu.memory_space<vmem>>, %arg8: memref<8x6xf32, #tpu.memory_space<vmem>>) attributes {dimension_semantics = [#tpu.dimension_semantics<parallel>], iteration_bounds = array<i64: 2>, scalar_prefetch = 0 : i64, scratch_operands = 0 : i64, tpu.core_type = #tpu.core_type<tc>, window_params = [{transform_indices = @transform_0, window_bounds = array<i64: 8, 32>}, {pipeline_mode = #tpu.pipeline_mode<synchronous>, transform_indices = @transform_1, window_bounds = array<i64: 32, 72>}, {pipeline_mode = #tpu.pipeline_mode<synchronous>, transform_indices = @transform_2, window_bounds = array<i64: 1, 72>}, {pipeline_mode = #tpu.pipeline_mode<synchronous>, transform_indices = @transform_3, window_bounds = array<i64: 72, 24>}, {pipeline_mode = #tpu.pipeline_mode<synchronous>, transform_indices = @transform_4, window_bounds = array<i64: 1, 24>}, {pipeline_mode = #tpu.pipeline_mode<synchronous>, transform_indices = @transform_5, window_bounds = array<i64: 24, 6>}, {pipeline_mode = #tpu.pipeline_mode<synchronous>, transform_indices = @transform_6, window_bounds = array<i64: 1, 6>}, {transform_indices = @transform_7, window_bounds = array<i64: 8, 6>}]} {
    %c0 = arith.constant 0 : index
    %c0_0 = arith.constant 0 : index
    %0 = vector.load %arg1[%c0, %c0_0] : memref<8x32xf32, #tpu.memory_space<vmem>>, vector<8x32xf32>
    %c0_1 = arith.constant 0 : index
    %c0_2 = arith.constant 0 : index
    %1 = vector.load %arg2[%c0_1, %c0_2] : memref<32x72xf32, #tpu.memory_space<vmem>>, vector<32x72xf32>
    %cst = arith.constant dense<0.000000e+00> : vector<8x72xf32>
    %2 = tpu.matmul %0, %1, %cst {dimension_numbers = #tpu.dot_dimension_numbers<[1], [0], [0], [1], [0, 0, 1, 1], [], []>} : vector<8x32xf32>, vector<32x72xf32>, vector<8x72xf32> -> vector<8x72xf32>
    %c0_3 = arith.constant 0 : index
    %c0_4 = arith.constant 0 : index
    %3 = vector.load %arg3[%c0_3, %c0_4] : memref<1x72xf32, #tpu.memory_space<vmem>>, vector<1x72xf32>
    %4 = vector.broadcast %3 : vector<1x72xf32> to vector<8x72xf32>
    %5 = arith.addf %2, %4 : vector<8x72xf32>
    %cst_5 = arith.constant 0.000000e+00 : f32
    %6 = vector.broadcast %cst_5 : f32 to vector<8x72xf32>
    %7 = arith.maximumf %5, %6 : vector<8x72xf32>
    %c0_6 = arith.constant 0 : index
    %c0_7 = arith.constant 0 : index
    %8 = vector.load %arg4[%c0_6, %c0_7] : memref<72x24xf32, #tpu.memory_space<vmem>>, vector<72x24xf32>
    %cst_8 = arith.constant dense<0.000000e+00> : vector<8x24xf32>
    %9 = tpu.matmul %7, %8, %cst_8 {dimension_numbers = #tpu.dot_dimension_numbers<[1], [0], [0], [1], [0, 0, 1, 1], [], []>} : vector<8x72xf32>, vector<72x24xf32>, vector<8x24xf32> -> vector<8x24xf32>
    %c0_9 = arith.constant 0 : index
    %c0_10 = arith.constant 0 : index
    %10 = vector.load %arg5[%c0_9, %c0_10] : memref<1x24xf32, #tpu.memory_space<vmem>>, vector<1x24xf32>
    %11 = vector.broadcast %10 : vector<1x24xf32> to vector<8x24xf32>
    %12 = arith.addf %9, %11 : vector<8x24xf32>
    %cst_11 = arith.constant 0.000000e+00 : f32
    %13 = vector.broadcast %cst_11 : f32 to vector<8x24xf32>
    %14 = arith.maximumf %12, %13 : vector<8x24xf32>
    %c0_12 = arith.constant 0 : index
    %c0_13 = arith.constant 0 : index
    %15 = vector.load %arg6[%c0_12, %c0_13] : memref<24x6xf32, #tpu.memory_space<vmem>>, vector<24x6xf32>
    %cst_14 = arith.constant dense<0.000000e+00> : vector<8x6xf32>
    %16 = tpu.matmul %14, %15, %cst_14 {dimension_numbers = #tpu.dot_dimension_numbers<[1], [0], [0], [1], [0, 0, 1, 1], [], []>} : vector<8x24xf32>, vector<24x6xf32>, vector<8x6xf32> -> vector<8x6xf32>
    %c0_15 = arith.constant 0 : index
    %c0_16 = arith.constant 0 : index
    %17 = vector.load %arg7[%c0_15, %c0_16] : memref<1x6xf32, #tpu.memory_space<vmem>>, vector<1x6xf32>
    %18 = vector.broadcast %17 : vector<1x6xf32> to vector<8x6xf32>
    %19 = arith.addf %16, %18 : vector<8x6xf32>
    %20 = math.exp %19 : vector<8x6xf32>
    %cst_17 = arith.constant 2.000000e+01 : f32
    %21 = vector.broadcast %cst_17 : f32 to vector<8x6xf32>
    %22 = arith.cmpf ogt, %19, %21 : vector<8x6xf32>
    %23 = math.log1p %20 : vector<8x6xf32>
    %24 = arith.select %22, %19, %23 : vector<8x6xi1>, vector<8x6xf32>
    %cst_18 = arith.constant 9.99999993E-9 : f32
    %25 = vector.broadcast %cst_18 : f32 to vector<8x6xf32>
    %26 = arith.addf %24, %25 : vector<8x6xf32>
    %27 = tpu.iota {dimensions = array<i32: 1>} : vector<1x6xi32>
    %c3_i32 = arith.constant 3 : i32
    %28 = vector.broadcast %c3_i32 : i32 to vector<1x6xi32>
    %29 = arith.cmpi slt, %27, %28 : vector<1x6xi32>
    %30 = vector.shape_cast %29 : vector<1x6xi1> to vector<1x6xi1>
    %31 = vector.broadcast %30 : vector<1x6xi1> to vector<8x6xi1>
    %32 = arith.select %31, %20, %26 : vector<8x6xi1>, vector<8x6xf32>
    %c0_19 = arith.constant 0 : index
    %c0_20 = arith.constant 0 : index
    %33 = vector.load %arg8[%c0_19, %c0_20] : memref<8x6xf32, #tpu.memory_space<vmem>>, vector<8x6xf32>
    tpu.vector_store %arg8[%c0_19, %c0_20], %32 {strides = array<i32>} : memref<8x6xf32, #tpu.memory_space<vmem>>, vector<8x6xf32>,
    return
  }
  func.func @transform_0(%arg0: i32) -> (i32, i32) {
    %c0_i32 = arith.constant 0 : i32
    %c0_i32_0 = arith.constant 0 : i32
    return %arg0, %c0_i32 : i32, i32
  }
  func.func @transform_1(%arg0: i32) -> (i32, i32) {
    %c0_i32 = arith.constant 0 : i32
    %c0_i32_0 = arith.constant 0 : i32
    %c0_i32_1 = arith.constant 0 : i32
    return %c0_i32, %c0_i32_0 : i32, i32
  }
  func.func @transform_2(%arg0: i32) -> (i32, i32) {
    %c0_i32 = arith.constant 0 : i32
    %c0_i32_0 = arith.constant 0 : i32
    %c0_i32_1 = arith.constant 0 : i32
    return %c0_i32, %c0_i32_0 : i32, i32
  }
  func.func @transform_3(%arg0: i32) -> (i32, i32) {
    %c0_i32 = arith.constant 0 : i32
    %c0_i32_0 = arith.constant 0 : i32
    %c0_i32_1 = arith.constant 0 : i32
    return %c0_i32, %c0_i32_0 : i32, i32
  }
  func.func @transform_4(%arg0: i32) -> (i32, i32) {
    %c0_i32 = arith.constant 0 : i32
    %c0_i32_0 = arith.constant 0 : i32
    %c0_i32_1 = arith.constant 0 : i32
    return %c0_i32, %c0_i32_0 : i32, i32
  }
  func.func @transform_5(%arg0: i32) -> (i32, i32) {
    %c0_i32 = arith.constant 0 : i32
    %c0_i32_0 = arith.constant 0 : i32
    %c0_i32_1 = arith.constant 0 : i32
    return %c0_i32, %c0_i32_0 : i32, i32
  }
  func.func @transform_6(%arg0: i32) -> (i32, i32) {
    %c0_i32 = arith.constant 0 : i32
    %c0_i32_0 = arith.constant 0 : i32
    %c0_i32_1 = arith.constant 0 : i32
    return %c0_i32, %c0_i32_0 : i32, i32
  }
  func.func @transform_7(%arg0: i32) -> (i32, i32) {
    %c0_i32 = arith.constant 0 : i32
    %c0_i32_0 = arith.constant 0 : i32
    return %arg0, %c0_i32 : i32, i32
  }
}

</mosaic_0001>

<bundles_post_ra>
// kernel: tpu_custom_call.1
= control target key start
LH: loop header
LB: loop body
LE: loop exit
PB: predicated region body
PF: predicated region fallthrough
CT: control target
= control target key end

     0   :  { %s527_s24 = smov 0   ;;  %s608_s0 = inlined_call_operand.vmem [shape: f32[16,32], index: 0, kind: input, shape index: {}]   ;;  %s609_s1 = inlined_call_operand.vmem [shape: f32[32,72], index: 1, kind: input, shape index: {}]   ;;  %s610_s2 = inlined_call_operand.vmem [shape: f32[1,72], index: 2, kind: input, shape index: {}]   ;;  %s611_s3 = inlined_call_operand.vmem [shape: f32[72,24], index: 3, kind: input, shape index: {}]   ;;  %s612_s4 = inlined_call_operand.vmem [shape: f32[1,24], index: 4, kind: input, shape index: {}]   ;;  %s613_s5 = inlined_call_operand.vmem [shape: f32[24,6], index: 5, kind: input, shape index: {}]   ;;  %s614_s6 = inlined_call_operand.vmem [shape: f32[1,6], index: 6, kind: input, shape index: {}]   ;;  %s615_s7 = inlined_call_operand.vmem [shape: f32[16,6], index: 7, kind: output, shape index: {}]  }
   0x1 LB: > { %s452_s25 = sadd.s32 4294967295, %s485_s24   ;;  %p456_p0 = scmp.ge.s32.totalorder %s485_s24, 1  ;;  %s485_s24 = sphi %s527_s24, %s17_s24  }
   0x2   : > { %p236_p1 = scmp.lt.s32.totalorder %s485_s24, 3 }
   0x4   : > { %p237_p2 = pnand %p456_p0, %p236_p1 }
   0x5   : > { %p266_p3 = scmp.lt.s32.totalorder (!%p237_p2), %s452_s25, 1 }
   0x6   : > { %240 = sbr.rel (%p237_p2) target bundleno = 439 (0x1b7), region = 48 }
   0xb   : > { %v278_v0 = vld [vmem:[%s609_s1 + $0x18] sm:$0xff]  ;;  %v277_v1 = vld [vmem:[%s609_s1 + $0x10] sm:$0xff]  ;;  %v316_v2 = vld [vmem:[%s611_s3 + $0x40] sm:$0xff]  ;;  %s617_s25 = smov (!%p266_p3, %s452_s25), 1  ;;  %vm283_vm0 = vcmask 261120   ;;  %vm321_vm1 = vcmask 588800   ;;  %v391_v32 = vlaneseq }
   0xc   : > { %299 = vmatpush.msra.mxu0 %v278_v0  ;;  %v315_v3 = vld [vmem:[%s611_s3 + $0x38] sm:$0xff]  ;;  %v276_v4 = vld [vmem:[%s609_s1 + $0x8] sm:$0xff]  ;;  %332 = vmatpush.msra.mxu1 %v316_v2  ;;  %v314_v5 = vld [vmem:[%s611_s3 + $0x30] sm:$0xff]  ;;  %s457_s17 = sshll.u32 %s617_s25, 3  ;;  %vm353_vm2 = vcmask 195584   ;;  %vm397_vm6 = vcmask 48128  }
   0xd   : > { %v275_v6 = vld [vmem:[%s609_s1] sm:$0xff]  ;;  %s269_s20 = scalar_lea.vmem %s608_s0, %s457_s17  ;;  %v313_v7 = vld [vmem:[%s611_s3 + $0x28] sm:$0xff]  ;;  %v311_v10 = vld [vmem:[%s611_s3 + $0x18] sm:$0xff]  ;;  %v392_v36 = vand.u32 127, %v391_v32  ;;  %s273_s29 = scalar_lea.vmem %s615_s7, %s457_s17 }
   0xe   : > { %300 = vmatpush.msra.mxu0 %v277_v1  ;;  %333 = vmatpush.msra.mxu1 %v315_v3  ;;  %v274_v8 = vld [vmem:[%s269_s20] sm:$0xff]  ;;  %v310_v11 = vld [vmem:[%s611_s3 + $0x10] sm:$0xff]  ;;  %v309_v12 = vld [vmem:[%s611_s3 + $0x8] sm:$0xff] }
   0xf   : > { %v312_v9 = vld [vmem:[%s611_s3 + $0x20] sm:$0xff]  ;;  %v348_v18 = vld [vmem:[%s613_s5 + $0x10] sm:$0xff]  ;;  %v347_v19 = vld [vmem:[%s613_s5 + $0x8] sm:$0xff]  ;;  %vm393_vm5 = vcmp.lt.s32.totalorder %v392_v36, 3 }
  0x10   : > { %301 = vmatpush.msra.mxu0 %v276_v4  ;;  %334 = vmatpush.msra.mxu1 %v314_v5  ;;  %v308_v13 = vld [vmem:[%s611_s3] sm:$0xff] }
  0x11   : > { %v472_v14 = vld [vmem:[%s610_s2] ss:$0 sm:$0xff]  ;;  %370 = vmatpush.msra.mxu2 %v348_v18 }
  0x12   : > { %302 = vmatpush.msra.mxu0 %v275_v6  ;;  %335 = vmatpush.msra.mxu1 %v313_v7  ;;  %v346_v20 = vld [vmem:[%s613_s5] sm:$0xff] }
  0x13   : > { %459 = vmatmul.msk.f32.vlgmr.msra.gmra.mxu0 %vm283_vm0, %v274_v8  ;;  %371 = vmatpush.msra.mxu2 %v347_v19  ;;  %v473_v21 = vld [vmem:[%s612_s4] ss:$0 sm:$0xff] }
  0x14   : > { %336 = vmatpush.msra.mxu1 %v312_v9  ;;  %v474_v25 = vld [vmem:[%s614_s6] ss:$0 sm:$0xff] }
  0x15   : > { %372 = vmatpush.msra.mxu2 %v346_v20 }
  0x16   : > { %337 = vmatpush.msra.mxu1 %v311_v10 }
  0x18   : > { %338 = vmatpush.msra.mxu1 %v310_v11 }
  0x1a   : > { %339 = vmatpush.msra.mxu1 %v309_v12 }
  0x1c   : > { %340 = vmatpush.msra.mxu1 %v308_v13 }
  0x90   : > { %v304_v15 = vpop.f32.mrf.mxu0 }
  0x91   : > { %v305_v16 = vadd.f32 %v472_v14, %v304_v15 }
  0x93   : > { %v307_v17 = vmax.f32 %v305_v16, 0.0 }
  0x95   : > { %460 = vmatmul.msk.f32.vlgmr.msra.gmra.mxu1 %vm321_vm1, %v307_v17 }
 0x112   : > { %v342_v22 = vpop.f32.mrf.mxu1 }
 0x113   : > { %v343_v23 = vadd.f32 %v473_v21, %v342_v22 }
 0x115   : > { %v345_v24 = vmax.f32 %v343_v23, 0.0 }
 0x117   : > { %461 = vmatmul.msk.f32.vlgmr.msra.gmra.mxu2 %vm353_vm2, %v345_v24 }
 0x19a   : > { %v374_v26 = vpop.f32.mrf.mxu2 }
 0x19b   : > { %v375_v27 = vadd.f32 %v474_v25, %v374_v26 }
 0x19d   : > { %v377_v28 = vmul.f32 1.442695, %v375_v27  ;;  %vm379_vm4 = vcmp.gt.f32.partialorder %v375_v27, 20.0 }
 0x19f   : > { %475 = vpow2.f32 %v377_v28 }
 0x1a5   : > { %v476_v29 = vpop.eup %475 }
 0x1a6   : > { %v380_v30 = vadd.f32 1.0, %v476_v29  ;;  %v383_v31 = vmul.f32 -0.5, %v476_v29  ;;  %v386_v34 = vand.u32 2147483647, %v476_v29 }
 0x1a8   : > { %477 = vlog2.f32 %v380_v30  ;;  %v384_v33 = vadd.f32 1.0, %v383_v31  ;;  %vm387_vm3 = vcmp.lt.f32.partialorder %v386_v34, 0.0004427343 }
 0x1aa   : > { %v385_v38 = vmul.f32 %v476_v29, %v384_v33 }
 0x1ae   : > { %v478_v35 = vpop.eup %477 }
 0x1af   : > { %v382_v37 = vmul.f32 0.6931472, %v478_v35 }
 0x1b1   : > { %v388_v39 = vsel %vm387_vm3, %v385_v38, %v382_v37 }
 0x1b2   : > { %v389_v40 = vsel %vm379_vm4, %v375_v27, %v388_v39 }
 0x1b3   : > { %v390_v41 = vadd.f32 1e-08, %v389_v40 }
 0x1b5   : > { %v396_v42 = vsel %vm393_vm5, %v476_v29, %v390_v41 }
 0x1b6   : > { %398 = vst.msk [vmem:[%s273_s29] sm:$0xff] %vm397_vm6, %v396_v42 }
 0x1b7 PF: > { %s17_s24 = sadd.s32 1, %s485_s24  }
 0x1b8   : > { %p14_p4 = scmp.ge.s32.totalorder %s17_s24, 4  }
 0x1ba   :  { %16 = sbr.rel (!%p14_p4) target bundleno = 1 (0x1), region = 78 }

</bundles_post_ra>
